<compile_context>
chip_gen: v5e
topology: v5e:2x2
jax: 0.10.0
libtpu: 0.0.40
codegen_flags: <defaults>
</compile_context>

<pallas_src>
import functools

import jax
import jax.numpy as jnp
from jax import lax
from jax.experimental import pallas as pl
from jax.experimental.pallas import tpu as pltpu

_PAD = 1.0e12   # sentinel for padded points: distances involving them are huge


def _chamfer_kernel(a1_ref, a2_ref, out_ref,
                    rowmin_ref, colmin_ref, rowsum_ref, *,
                    n1, n2, t1, t2, strip, num_c1, mask_rows, mask_cols):
    c2 = pl.program_id(1)          # tile index along N2 (array2 points)
    c1 = pl.program_id(2)          # tile index along N1 (array1 points)
    last_c2 = pl.num_programs(1) - 1
    last_c1 = pl.num_programs(2) - 1

    # ---- accumulator init -------------------------------------------------
    @pl.when(jnp.logical_and(c2 == 0, c1 == 0))
    def _init_rowsum():
        rowsum_ref[...] = jnp.zeros_like(rowsum_ref)

    @pl.when(c1 == 0)
    def _init_rowmin():
        rowmin_ref[...] = jnp.full_like(rowmin_ref, jnp.inf)

    if num_c1 == 1:                # fast path: whole N1 in one tile, no RMW slice
        def cm_read():
            return colmin_ref[...]

        def cm_write(v):
            colmin_ref[...] = v
    else:
        col_start = pl.multiple_of(c1 * t1, t1)

        def cm_read():
            return colmin_ref[:, pl.ds(col_start, t1)]

        def cm_write(v):
            colmin_ref[:, pl.ds(col_start, t1)] = v

    @pl.when(c2 == 0)
    def _init_colmin():
        cm_write(jnp.full((1, t1), jnp.inf, dtype=jnp.float32))

    # ---- fused distances + running mins, in sublane strips -----------------
    a1 = a1_ref[0].astype(jnp.float32)                    # (F, t1), lane-dense
    sq1 = jnp.sum(a1 * a1, axis=0, keepdims=True)         # (1, t1)
    a2 = a2_ref[0].astype(jnp.float32)                    # (t2, F)
    sq2 = jnp.sum(a2 * a2, axis=1, keepdims=True)         # (t2, 1)

    cm_acc = cm_read()                                    # (1, t1)
    for start in range(0, t2, strip):
        sz = min(strip, t2 - start)
        a2_s = a2[start:start + sz, :]
        cross = jnp.dot(a2_s, a1, preferred_element_type=jnp.float32)
        dist = jnp.maximum(sq2[start:start + sz, :] + sq1 - 2.0 * cross, 0.0)
        rowmin_ref[start:start + sz, :] = jnp.minimum(
            rowmin_ref[start:start + sz, :],
            jnp.min(dist, axis=1, keepdims=True))
        cm_acc = jnp.minimum(cm_acc, jnp.min(dist, axis=0, keepdims=True))
    cm_write(cm_acc)

    # ---- fold finished row-mins of this N2 tile into the per-batch sum -----
    @pl.when(c1 == last_c1)
    def _fold_rowsum():
        rm = rowmin_ref[...]                              # (t2, 1)
        if mask_rows:   # only traced when array2 was sentinel-padded
            row_ids = lax.broadcasted_iota(jnp.int32, (t2, 1), 0) + c2 * t2
            rm = jnp.where(row_ids < n2, rm, 0.0)
        rowsum_ref[...] += jnp.sum(rm, axis=0, keepdims=True)

    # ---- finalize this batch element (outputs written exactly once) --------
    @pl.when(jnp.logical_and(c2 == last_c2, c1 == last_c1))
    def _finalize():
        av1 = rowsum_ref[...] * (1.0 / n2)                # (1, 1)
        cm = colmin_ref[...]                              # (1, n1_pad)
        if mask_cols:   # only traced when array1 was sentinel-padded
            ids = lax.broadcasted_iota(jnp.int32, cm.shape, 1)
            cm = jnp.where(ids < n1, cm, 0.0)
        av2 = jnp.sum(cm, axis=1, keepdims=True) * (1.0 / n1)   # (1, 1)
        lane = lax.broadcasted_iota(jnp.int32, (1, 1, 2), 2)
        out_ref[...] = jnp.where(lane == 0,
                                 av1.reshape(1, 1, 1), av2.reshape(1, 1, 1))


def _pick_tile(n, cap, align):
    """Tile size along an axis: full extent if it fits, else an aligned cap."""
    if n <= cap:
        return n
    return max(align, (cap // align) * align)


def point_loss_test(array1, array2, *, tile_n1=2048, tile_n2=512):
    """Returns (dist_all, dist1, dist2) exactly like PointLoss_test.forward."""
    B, N1, F = array1.shape
    B2, N2, F2 = array2.shape
    assert B == B2 and F == F2

    # Zero-pad features to a sublane multiple (does not change any distance).
    f_pad = max(8, -(-F // 8) * 8)

    # VMEM-aware clamps: keep double-buffered a1/a2 blocks modest so the same
    # tiling also fits v7x's 64 MiB physical / 32 MiB scoped-default VMEM.
    tile_n1 = min(tile_n1, max(128, ((1 << 20) // f_pad) // 128 * 128))
    tile_n2 = min(tile_n2, max(8, ((1 << 19) // f_pad) // 8 * 8))

    t1 = _pick_tile(N1, tile_n1, 128)
    t2 = _pick_tile(N2, tile_n2, 8)
    c1_tiles = -(-N1 // t1)
    c2_tiles = -(-N2 // t2)
    n1_pad = c1_tiles * t1
    n2_pad = c2_tiles * t2

    # Sublane-strip size: keep roughly <= 32 live vregs of distances per strip.
    strip = max(8, min(t2, ((32 * 1024) // max(t1, 1)) // 8 * 8))

    a1 = array1
    a2 = array2
    if f_pad != F:
        a1 = jnp.pad(a1, ((0, 0), (0, 0), (0, f_pad - F)))
        a2 = jnp.pad(a2, ((0, 0), (0, 0), (0, f_pad - F)))
    a1t = jnp.transpose(a1, (0, 2, 1))                    # (B, f_pad, N1) lane-dense
    if n1_pad != N1:   # sentinel-pad array1 points (far from everything)
        a1t = jnp.pad(a1t, ((0, 0), (0, 0), (0, n1_pad - N1)),
                      constant_values=_PAD)
    if n2_pad != N2:   # sentinel-pad array2 points (opposite sign sentinel)
        a2 = jnp.pad(a2, ((0, 0), (0, n2_pad - N2), (0, 0)),
                     constant_values=-_PAD)

    kernel = functools.partial(
        _chamfer_kernel, n1=N1, n2=N2, t1=t1, t2=t2, strip=strip,
        num_c1=c1_tiles, mask_rows=(n2_pad != N2), mask_cols=(n1_pad != N1))

    # TODO(synk): for B == 1 on v7x, shard the c2 axis across the two
    # TensorCores with per-shard partial outputs instead of relying on the
    # batch axis for megacore parallelism.
    out = pl.pallas_call(
        kernel,
        out_shape=jax.ShapeDtypeStruct((B, 1, 2), jnp.float32),
        grid_spec=pltpu.PrefetchScalarGridSpec(
            num_scalar_prefetch=0,
            grid=(B, c2_tiles, c1_tiles),
            in_specs=[
                pl.BlockSpec((1, f_pad, t1), lambda b, j2, j1: (b, 0, j1)),
                pl.BlockSpec((1, t2, f_pad), lambda b, j2, j1: (b, j2, 0)),
            ],
            out_specs=pl.BlockSpec((1, 1, 2), lambda b, j2, j1: (b, 0, 0)),
            scratch_shapes=[
                pltpu.VMEM((t2, 1), jnp.float32),      # running row-min (per c2 tile)
                pltpu.VMEM((1, n1_pad), jnp.float32),  # running col-min (per batch)
                pltpu.VMEM((1, 1), jnp.float32),       # sum of row-mins (per batch)
            ]),
        compiler_params=pltpu.CompilerParams(
            dimension_semantics=("parallel", "arbitrary", "arbitrary"),
            vmem_limit_bytes=32 * 1024 * 1024),
    )(a1t, a2)

    av1 = out[:, 0, 0]   # per-batch mean_{array2} min_{array1} ||.||^2
    av2 = out[:, 0, 1]   # per-batch mean_{array1} min_{array2} ||.||^2
    dist1 = jnp.mean(av1)
    dist2 = jnp.mean(av2)
    return dist1 + dist2, dist1, dist2


def _reference(array1, array2):
    """Pure-JAX reference mirroring chamfer_distance_numpy_test."""
    def per_batch(a1, a2):
        d = jnp.sum((a2[:, None, :] - a1[None, :, :]) ** 2, axis=-1)  # (N2, N1)
        av1 = jnp.mean(jnp.min(d, axis=1))
        av2 = jnp.mean(jnp.min(d, axis=0))
        return av1, av2
    av1s, av2s = jax.vmap(per_batch)(array1, array2)
    d1 = jnp.mean(av1s)
    d2 = jnp.mean(av2s)
    return d1 + d2, d1, d2


if __name__ == "__main__":
    key = jax.random.PRNGKey(0)

    def run_case(B, N1, N2, F, **tiles):
        k1, k2 = jax.random.split(jax.random.fold_in(key, N1 * 1000 + N2))
        a1 = jax.random.normal(k1, (B, N1, F), dtype=jnp.float32)
        a2 = jax.random.normal(k2, (B, N2, F), dtype=jnp.float32)
        got = jax.jit(functools.partial(point_loss_test, **tiles))(a1, a2)
        jax.block_until_ready(got)
        ref = _reference(a1, a2)
        for g, r in zip(got, ref):
            # MXU (||a||^2+||b||^2-2ab) formulation trades a little f32
            # cancellation for speed; tolerance is set accordingly.
            assert jnp.allclose(g, r, rtol=5e-4, atol=1e-5), (g, r)

    # Tiny single-tile case (matches the module's intended small point clouds).
    run_case(2, 16, 16, 3)
    # Multi-tile case: exercises sentinel padding, colmin slice RMW, fold masks.
    run_case(2, 200, 136, 3, tile_n1=128, tile_n2=64)
    # Larger single-tile case: exercises the fused sublane-strip loop.
    run_case(2, 300, 200, 3)

    print("KERNEL_OK")
</pallas_src>

<mosaic_0001>
module attributes {stable_mosaic.version = 11 : i64} {
  func.func @_chamfer_kernel(%arg0: i32, %arg1: i32, %arg2: i32, %arg3: memref<1x8x16xf32, #tpu.memory_space<vmem>>, %arg4: memref<1x16x8xf32, #tpu.memory_space<vmem>>, %arg5: memref<1x1x2xf32, #tpu.memory_space<vmem>>, %arg6: memref<16x1xf32, #tpu.memory_space<vmem>>, %arg7: memref<1x16xf32, #tpu.memory_space<vmem>>, %arg8: memref<1x1xf32, #tpu.memory_space<vmem>>) attributes {dimension_semantics = [#tpu.dimension_semantics<parallel>, #tpu.dimension_semantics<arbitrary>, #tpu.dimension_semantics<arbitrary>], iteration_bounds = array<i64: 2, 1, 1>, scalar_prefetch = 0 : i64, scratch_operands = 3 : i64, tpu.core_type = #tpu.core_type<tc>, window_params = [{transform_indices = @transform_0, window_bounds = array<i64: 1, 8, 16>}, {transform_indices = @transform_1, window_bounds = array<i64: 1, 16, 8>}, {transform_indices = @transform_2, window_bounds = array<i64: 1, 1, 2>}]} {
    %c0_i32 = arith.constant 0 : i32
    %0 = arith.cmpi eq, %arg1, %c0_i32 : i32
    %c0_i32_0 = arith.constant 0 : i32
    %1 = arith.cmpi eq, %arg2, %c0_i32_0 : i32
    %2 = arith.andi %0, %1 : i1
    %3 = arith.extui %2 : i1 to i32
    %c0_i32_1 = arith.constant 0 : i32
    %4 = arith.cmpi ne, %3, %c0_i32_1 : i32
    scf.if %4 {
      %cst_30 = arith.constant 0.000000e+00 : f32
      %48 = vector.broadcast %cst_30 : f32 to vector<1x1xf32>
      %c0_31 = arith.constant 0 : index
      %c0_32 = arith.constant 0 : index
      %49 = vector.load %arg8[%c0_31, %c0_32] : memref<1x1xf32, #tpu.memory_space<vmem>>, vector<1x1xf32>
      tpu.vector_store %arg8[%c0_31, %c0_32], %48 {strides = array<i32>} : memref<1x1xf32, #tpu.memory_space<vmem>>, vector<1x1xf32>,
    } else {
    }
    %c0_i32_2 = arith.constant 0 : i32
    %5 = arith.cmpi eq, %arg2, %c0_i32_2 : i32
    %6 = arith.extui %5 : i1 to i32
    %c0_i32_3 = arith.constant 0 : i32
    %7 = arith.cmpi ne, %6, %c0_i32_3 : i32
    scf.if %7 {
      %cst_30 = arith.constant 0x7F800000 : f32
      %48 = vector.broadcast %cst_30 : f32 to vector<16x1xf32>
      %c0_31 = arith.constant 0 : index
      %c0_32 = arith.constant 0 : index
      %49 = vector.load %arg6[%c0_31, %c0_32] : memref<16x1xf32, #tpu.memory_space<vmem>>, vector<16x1xf32>
      tpu.vector_store %arg6[%c0_31, %c0_32], %48 {strides = array<i32>} : memref<16x1xf32, #tpu.memory_space<vmem>>, vector<16x1xf32>,
    } else {
    }
    %c0_i32_4 = arith.constant 0 : i32
    %8 = arith.cmpi eq, %arg1, %c0_i32_4 : i32
    %9 = arith.extui %8 : i1 to i32
    %c0_i32_5 = arith.constant 0 : i32
    %10 = arith.cmpi ne, %9, %c0_i32_5 : i32
    scf.if %10 {
      %cst_30 = arith.constant 0x7F800000 : f32
      %48 = vector.broadcast %cst_30 : f32 to vector<1x16xf32>
      %c0_31 = arith.constant 0 : index
      %c0_32 = arith.constant 0 : index
      %49 = vector.load %arg7[%c0_31, %c0_32] : memref<1x16xf32, #tpu.memory_space<vmem>>, vector<1x16xf32>
      tpu.vector_store %arg7[%c0_31, %c0_32], %48 {strides = array<i32>} : memref<1x16xf32, #tpu.memory_space<vmem>>, vector<1x16xf32>,
    } else {
    }
    %c0 = arith.constant 0 : index
    %c0_6 = arith.constant 0 : index
    %c0_7 = arith.constant 0 : index
    %11 = vector.load %arg3[%c0, %c0_6, %c0_7] : memref<1x8x16xf32, #tpu.memory_space<vmem>>, vector<1x8x16xf32>
    %12 = vector.shape_cast %11 : vector<1x8x16xf32> to vector<8x16xf32>
    %13 = arith.mulf %12, %12 : vector<8x16xf32>
    %cst = arith.constant dense<0.000000e+00> : vector<16xf32>
    %14 = vector.multi_reduction <add>, %13, %cst [0] : vector<8x16xf32> to vector<16xf32>
    %15 = vector.shape_cast %14 : vector<16xf32> to vector<1x16xf32>
    %c0_8 = arith.constant 0 : index
    %c0_9 = arith.constant 0 : index
    %c0_10 = arith.constant 0 : index
    %16 = vector.load %arg4[%c0_8, %c0_9, %c0_10] : memref<1x16x8xf32, #tpu.memory_space<vmem>>, vector<1x16x8xf32>
    %17 = vector.shape_cast %16 : vector<1x16x8xf32> to vector<16x8xf32>
    %18 = arith.mulf %17, %17 : vector<16x8xf32>
    %cst_11 = arith.constant dense<0.000000e+00> : vector<16xf32>
    %19 = vector.multi_reduction <add>, %18, %cst_11 [1] : vector<16x8xf32> to vector<16xf32>
    %20 = vector.shape_cast %19 : vector<16xf32> to vector<16x1xf32>
    %c0_12 = arith.constant 0 : index
    %c0_13 = arith.constant 0 : index
    %21 = vector.load %arg7[%c0_12, %c0_13] : memref<1x16xf32, #tpu.memory_space<vmem>>, vector<1x16xf32>
    %cst_14 = arith.constant dense<0.000000e+00> : vector<16x16xf32>
    %22 = tpu.matmul %17, %12, %cst_14 {dimension_numbers = #tpu.dot_dimension_numbers<[1], [0], [0], [1], [0, 0, 1, 1], [], []>} : vector<16x8xf32>, vector<8x16xf32>, vector<16x16xf32> -> vector<16x16xf32>
    %23 = vector.broadcast %20 : vector<16x1xf32> to vector<16x16xf32>
    %24 = vector.broadcast %15 : vector<1x16xf32> to vector<16x16xf32>
    %25 = arith.addf %23, %24 : vector<16x16xf32>
    %cst_15 = arith.constant 2.000000e+00 : f32
    %26 = vector.broadcast %cst_15 : f32 to vector<16x16xf32>
    %27 = arith.mulf %26, %22 : vector<16x16xf32>
    %28 = arith.subf %25, %27 : vector<16x16xf32>
    %cst_16 = arith.constant 0.000000e+00 : f32
    %29 = vector.broadcast %cst_16 : f32 to vector<16x16xf32>
    %30 = arith.maximumf %28, %29 : vector<16x16xf32>
    %c0_17 = arith.constant 0 : index
    %c0_18 = arith.constant 0 : index
    %31 = vector.load %arg6[%c0_17, %c0_18] : memref<16x1xf32, #tpu.memory_space<vmem>>, vector<16x1xf32>
    %cst_19 = arith.constant dense<0x7F800000> : vector<16xf32>
    %32 = vector.multi_reduction <minimumf>, %30, %cst_19 [1] : vector<16x16xf32> to vector<16xf32>
    %33 = vector.shape_cast %32 : vector<16xf32> to vector<16x1xf32>
    %34 = arith.minimumf %31, %33 : vector<16x1xf32>
    %c0_20 = arith.constant 0 : index
    %c0_21 = arith.constant 0 : index
    %35 = vector.load %arg6[%c0_20, %c0_21] : memref<16x1xf32, #tpu.memory_space<vmem>>, vector<16x1xf32>
    tpu.vector_store %arg6[%c0_20, %c0_21], %34 {strides = array<i32>} : memref<16x1xf32, #tpu.memory_space<vmem>>, vector<16x1xf32>,
    %cst_22 = arith.constant dense<0x7F800000> : vector<16xf32>
    %36 = vector.multi_reduction <minimumf>, %30, %cst_22 [0] : vector<16x16xf32> to vector<16xf32>
    %37 = vector.shape_cast %36 : vector<16xf32> to vector<1x16xf32>
    %38 = arith.minimumf %21, %37 : vector<1x16xf32>
    %c0_23 = arith.constant 0 : index
    %c0_24 = arith.constant 0 : index
    %39 = vector.load %arg7[%c0_23, %c0_24] : memref<1x16xf32, #tpu.memory_space<vmem>>, vector<1x16xf32>
    tpu.vector_store %arg7[%c0_23, %c0_24], %38 {strides = array<i32>} : memref<1x16xf32, #tpu.memory_space<vmem>>, vector<1x16xf32>,
    %c0_i32_25 = arith.constant 0 : i32
    %40 = arith.cmpi eq, %arg2, %c0_i32_25 : i32
    %41 = arith.extui %40 : i1 to i32
    %c0_i32_26 = arith.constant 0 : i32
    %42 = arith.cmpi ne, %41, %c0_i32_26 : i32
    scf.if %42 {
      %c0_30 = arith.constant 0 : index
      %c0_31 = arith.constant 0 : index
      %48 = vector.load %arg6[%c0_30, %c0_31] : memref<16x1xf32, #tpu.memory_space<vmem>>, vector<16x1xf32>
      %c0_32 = arith.constant 0 : index
      %c0_33 = arith.constant 0 : index
      %49 = vector.load %arg8[%c0_32, %c0_33] : memref<1x1xf32, #tpu.memory_space<vmem>>, vector<1x1xf32>
      %cst_34 = arith.constant dense<0.000000e+00> : vector<1xf32>
      %50 = vector.multi_reduction <add>, %48, %cst_34 [0] : vector<16x1xf32> to vector<1xf32>
      %51 = vector.shape_cast %50 : vector<1xf32> to vector<1x1xf32>
      %52 = arith.addf %49, %51 : vector<1x1xf32>
      %c0_35 = arith.constant 0 : index
      %c0_36 = arith.constant 0 : index
      %53 = vector.load %arg8[%c0_35, %c0_36] : memref<1x1xf32, #tpu.memory_space<vmem>>, vector<1x1xf32>
      tpu.vector_store %arg8[%c0_35, %c0_36], %52 {strides = array<i32>} : memref<1x1xf32, #tpu.memory_space<vmem>>, vector<1x1xf32>,
    } else {
    }
    %c0_i32_27 = arith.constant 0 : i32
    %43 = arith.cmpi eq, %arg1, %c0_i32_27 : i32
    %c0_i32_28 = arith.constant 0 : i32
    %44 = arith.cmpi eq, %arg2, %c0_i32_28 : i32
    %45 = arith.andi %43, %44 : i1
    %46 = arith.extui %45 : i1 to i32
    %c0_i32_29 = arith.constant 0 : i32
    %47 = arith.cmpi ne, %46, %c0_i32_29 : i32
    scf.if %47 {
      %c0_30 = arith.constant 0 : index
      %c0_31 = arith.constant 0 : index
      %48 = vector.load %arg8[%c0_30, %c0_31] : memref<1x1xf32, #tpu.memory_space<vmem>>, vector<1x1xf32>
      %cst_32 = arith.constant 6.250000e-02 : f32
      %49 = vector.broadcast %cst_32 : f32 to vector<1x1xf32>
      %50 = arith.mulf %48, %49 : vector<1x1xf32>
      %c0_33 = arith.constant 0 : index
      %c0_34 = arith.constant 0 : index
      %51 = vector.load %arg7[%c0_33, %c0_34] : memref<1x16xf32, #tpu.memory_space<vmem>>, vector<1x16xf32>
      %cst_35 = arith.constant dense<0.000000e+00> : vector<1xf32>
      %52 = vector.multi_reduction <add>, %51, %cst_35 [1] : vector<1x16xf32> to vector<1xf32>
      %53 = vector.shape_cast %52 : vector<1xf32> to vector<1x1xf32>
      %cst_36 = arith.constant 6.250000e-02 : f32
      %54 = vector.broadcast %cst_36 : f32 to vector<1x1xf32>
      %55 = arith.mulf %53, %54 : vector<1x1xf32>
      %56 = tpu.iota {dimensions = array<i32: 2>} : vector<1x1x2xi32>
      %c0_i32_37 = arith.constant 0 : i32
      %57 = vector.broadcast %c0_i32_37 : i32 to vector<1x1x2xi32>
      %58 = arith.cmpi eq, %56, %57 : vector<1x1x2xi32>
      %59 = vector.shape_cast %50 : vector<1x1xf32> to vector<1x1x1xf32>
      %60 = vector.shape_cast %55 : vector<1x1xf32> to vector<1x1x1xf32>
      %61 = vector.shape_cast %59 : vector<1x1x1xf32> to vector<1x1x1xf32>
      %62 = vector.broadcast %61 : vector<1x1x1xf32> to vector<1x1x2xf32>
      %63 = vector.shape_cast %60 : vector<1x1x1xf32> to vector<1x1x1xf32>
      %64 = vector.broadcast %63 : vector<1x1x1xf32> to vector<1x1x2xf32>
      %65 = arith.select %58, %62, %64 : vector<1x1x2xi1>, vector<1x1x2xf32>
      %c0_38 = arith.constant 0 : index
      %c0_39 = arith.constant 0 : index
      %c0_40 = arith.constant 0 : index
      %66 = vector.load %arg5[%c0_38, %c0_39, %c0_40] : memref<1x1x2xf32, #tpu.memory_space<vmem>>, vector<1x1x2xf32>
      tpu.vector_store %arg5[%c0_38, %c0_39, %c0_40], %65 {strides = array<i32>} : memref<1x1x2xf32, #tpu.memory_space<vmem>>, vector<1x1x2xf32>,
    } else {
    }
    return
  }
  func.func @transform_0(%arg0: i32, %arg1: i32, %arg2: i32) -> (i32, i32, i32) {
    %c0_i32 = arith.constant 0 : i32
    %c0_i32_0 = arith.constant 0 : i32
    return %arg0, %c0_i32, %arg2 : i32, i32, i32
  }
  func.func @transform_1(%arg0: i32, %arg1: i32, %arg2: i32) -> (i32, i32, i32) {
    %c0_i32 = arith.constant 0 : i32
    %c0_i32_0 = arith.constant 0 : i32
    return %arg0, %arg1, %c0_i32 : i32, i32, i32
  }
  func.func @transform_2(%arg0: i32, %arg1: i32, %arg2: i32) -> (i32, i32, i32) {
    %c0_i32 = arith.constant 0 : i32
    %c0_i32_0 = arith.constant 0 : i32
    %c0_i32_1 = arith.constant 0 : i32
    return %arg0, %c0_i32, %c0_i32_0 : i32, i32, i32
  }
}

</mosaic_0001>

<bundles_post_ra>
// kernel: point_loss_test.1
= control target key start
LH: loop header
LB: loop body
LE: loop exit
PB: predicated region body
PF: predicated region fallthrough
CT: control target
= control target key end

     0   :  { %s507_s9 = smov 0   ;;  %s509_s10 = smov 0   ;;  %s562_s0 = inlined_call_operand.vmem [shape: f32[2,8,16], index: 0, kind: input, shape index: {}]   ;;  %s563_s1 = inlined_call_operand.vmem [shape: f32[2,16,8], index: 1, kind: input, shape index: {}]   ;;  %s564_s2 = inlined_call_operand.vmem [shape: f32[2,1,2], index: 2, kind: output, shape index: {}]  }
   0x1   :  { %s511_s11 = smov 0  }
   0x2 LB: > { %s31_s12 = sadd.s32 1, %s483_s10  ;;  %p426_p0 = scmp.ge.s32.totalorder %s487_s11, 1  ;;  %s487_s11 = sphi %s511_s11, %s12_s11   ;;  %s483_s10 = sphi %s509_s10, %s566_s10   ;;  %s479_s9 = sphi %s507_s9, %s565_s9  }
   0x3   : > { %p33_p1 = scmp.ge.s32.totalorder %s31_s12, 2  ;;  %p152_p2 = scmp.lt.s32.totalorder %s487_s11, 3 }
   0x5   : > { %s568_s12 = smov (%p33_p1, %s31_s12), 0  ;;  %p153_p3 = pnand %p426_p0, %p152_p2 }
   0x6   : > { %p183_p4 = scmp.lt.s32.totalorder (!%p153_p3), %s479_s9, 1 }
   0x7   : > { %156 = sbr.rel (%p153_p3) target bundleno = 406 (0x196), region = 28 }
   0xc   : > { %s570_s9 = smov (!%p183_p4, %s479_s9), 1  ;;  %vm236_vm0 = vcmask 64512   ;;  %vm224_vm1 = vcmask 130048   ;;  %vm220_vm2 = vcmask 122880   ;;  %v489_v12 = vmov inf  }
   0xd   : > { %s427_s13 = sshll.u32 %s570_s9, 3  ;;  %s434_s14 = sshll.u32 %s570_s9, 4  ;;  %221 = vst.msk [vmem:[#allocation3] sm:$0x1] %vm220_vm2, %v489_v12  ;;  %vm214_vm3 = vcmask 7168   ;;  %vm209_vm4 = vcmask 0  }
   0xe   : > { %s189_s17 = scalar_lea.vmem %s562_s0, %s427_s13  ;;  %s198_s20 = scalar_lea.vmem %s563_s1, %s434_s14  ;;  %215 = vst.msk [vmem:[#allocation2] sm:$0xff] %vm214_vm3, %v489_v12  ;;  %v490_v41 = vmov 0.0   ;;  %v491_v42 = vmov 0   ;;  %vm341_vm6 = vcmask 8192  }
   0xf   : > { %v222_v0 = vld [vmem:[%s189_s17] sm:$0xff]  ;;  %v233_v2 = vld [vmem:[%s198_s20 + $0x8] sm:$0xff]  ;;  %216 = vst.msk [vmem:[#allocation2 + $0x8] sm:$0xff] %vm214_vm3, %v489_v12  ;;  %463 = vset.pattern.permute.xlu2 %v491_v42  ;;  %464 = vset.pattern.permute.xlu0 %v491_v42  ;;  %s202_s23 = scalar_lea.vmem %s564_s2, %s570_s9 }
  0x10   : > { %v232_v1 = vld [vmem:[%s198_s20] sm:$0xff]  ;;  %265 = vmatpush.msra.mxu0 %v222_v0  ;;  %435 = vmatpush.msra.mxu1 %v222_v0  ;;  %v235_v5 = vmul.f32 %v233_v2, %v233_v2  ;;  %v223_v7 = vmul.f32 %v222_v0, %v222_v0  ;;  %210 = vst.msk [vmem:[#allocation4] sm:$0x1] %vm209_vm4, %v490_v41 }
  0x11   : > { %v234_v3 = vmul.f32 %v232_v1, %v232_v1  ;;  %430 = vmatmul.msk.f32.vlgmr.msra.gmra.mxu0 %vm236_vm0, %v232_v1  ;;  %431 = vmatmul.msk.f32.vlgmr.msra.gmra.mxu1 %vm236_vm0, %v233_v2  ;;  %v331_v1 = vlaneseq }
  0x12   : > { %v240_v6 = vsel %vm236_vm0, %v235_v5, 0.0  ;;  %v225_v8 = vsel %vm224_vm1, %v223_v7, 0.0 }
  0x13   : > { %v237_v4 = vsel %vm236_vm0, %v234_v3, 0.0  ;;  %v226_v9 = vrot.slane %v225_v8, 4  ;;  %v332_v2 = vand.u32 127, %v331_v1 }
  0x14   : > { %238 = vadd.xlane.f32.xlu0 %v237_v4  ;;  %v243_v36 = vld [vmem:[#allocation3] sm:$0x1] }
  0x15   : > { %v227_v10 = vadd.f32 %v226_v9, %v225_v8  ;;  %v281_v43 = vld [vmem:[#allocation2] sm:$0xff]  ;;  %vm333_vm5 = vcmp.eq.s32.totalorder %v332_v2, 0 }
  0x16   : > { %v282_v46 = vld [vmem:[#allocation2 + $0x8] sm:$0xff] }
  0x17   : > { %v228_v11 = vrot.slane %v227_v10, 2  ;;  %v309_v59 = vld [vmem:[#allocation4] sm:$0x1] }
  0x19   : > { %v229_v13 = vadd.f32 %v228_v11, %v227_v10 }
  0x1b   : > { %v230_v14 = vrot.slane %v229_v13, 1 }
  0x1c   : > { %241 = vadd.xlane.f32.xlu0 %v240_v6 }
  0x1d   : > { %v231_v16 = vadd.f32 %v230_v14, %v229_v13 }
  0x87   : > { %v239_v15 = vpop.xlane.xlu0 %238 }
  0x88   : > { %v273_v17 = vadd.f32 %v239_v15, %v231_v16 }
  0x8e   : > { %v267_v19 = vpop.f32.mrf.mxu0  ;;  %v270_v22 = vpop.f32.mrf.mxu1 }
  0x8f   : > { %v242_v18 = vpop.xlane.xlu0 %241  ;;  %v275_v21 = vmul.f32 2.0, %v267_v19  ;;  %v276_v23 = vmul.f32 2.0, %v270_v22 }
  0x90   : > { %v274_v20 = vadd.f32 %v242_v18, %v231_v16 }
  0x91   : > { %v277_v24 = vsub.f32 %v273_v17, %v275_v21 }
  0x92   : > { %v278_v25 = vsub.f32 %v274_v20, %v276_v23 }
  0x93   : > { %v279_v26 = vmax.f32 %v277_v24, 0.0 }
  0x94   : > { %v280_v27 = vmax.f32 %v278_v25, 0.0 }
  0x95   : > { %v283_v28 = vsel %vm224_vm1, %v279_v26, inf }
  0x96   : > { %284 = vmin.xlane.f32.xlu1 %v283_v28  ;;  %v286_v29 = vsel %vm224_vm1, %v280_v27, inf }
  0x97   : > { %v294_v30 = vmin.f32 %v283_v28, %v286_v29 }
  0x99   : > { %v295_v31 = vrot.slane %v294_v30, 4 }
  0x9b   : > { %v296_v32 = vmin.f32 %v294_v30, %v295_v31 }
  0x9d   : > { %v297_v33 = vrot.slane %v296_v32, 2 }
  0x9e   : > { %287 = vmin.xlane.f32.xlu1 %v286_v29 }
  0x9f   : > { %v298_v34 = vmin.f32 %v296_v32, %v297_v33 }
  0xa1   : > { %v299_v35 = vrot.slane %v298_v34, 1 }
  0xa3   : > { %v300_v37 = vmin.f32 %v298_v34, %v299_v35 }
  0xa5   : > { %v301_v38 = vmin.f32 %v243_v36, %v300_v37 }
  0xa7   : > { %303 = vst.msk [vmem:[#allocation3] sm:$0x1] %vm220_vm2, %v301_v38 }
  0xae   : > { %v326_v39 = vld [vmem:[#allocation3] sm:$0x1] }
  0xaf   : > { %v327_v40 = vsel %vm220_vm2, %v326_v39, 0.0 }
  0xb0   : > { %328 = vadd.xlane.f32.xlu2 %v327_v40 }
 0x109   : > { %v285_v44 = vpop.xlane.xlu1 %284 }
 0x10a   : > { %v289_v45 = vmin.f32 %v281_v43, %v285_v44 }
 0x10c   : > { %292 = vst.msk [vmem:[#allocation2] sm:$0xff] %vm214_vm3, %v289_v45 }
 0x111   : > { %v288_v47 = vpop.xlane.xlu1 %287 }
 0x112   : > { %v290_v48 = vmin.f32 %v282_v46, %v288_v47 }
 0x113   : > { %v307_v49 = vld [vmem:[#allocation2] sm:$0xff] }
 0x114   : > { %293 = vst.msk [vmem:[#allocation2 + $0x8] sm:$0xff] %vm214_vm3, %v290_v48  ;;  %v310_v51 = vsel %vm214_vm3, %v307_v49, 0.0 }
 0x11b   : > { %v308_v50 = vld [vmem:[#allocation2 + $0x8] sm:$0xff] }
 0x11c   : > { %v311_v52 = vsel %vm214_vm3, %v308_v50, 0.0 }
 0x11d   : > { %v312_v53 = vadd.f32 %v311_v52, %v310_v51 }
 0x11f   : > { %v313_v54 = vrot.slane %v312_v53, 4 }
 0x121   : > { %v314_v55 = vadd.f32 %v313_v54, %v312_v53 }
 0x123   : > { %v315_v56 = vrot.slane %v314_v55, 2  ;;  %v329_v0 = vpop.xlane.xlu2 %328 }
 0x124   : > { %v330_v4 = vmul.f32 0.0625, %v329_v0 }
 0x125   : > { %v316_v57 = vadd.f32 %v315_v56, %v314_v55 }
 0x127   : > { %v317_v58 = vrot.slane %v316_v57, 1 }
 0x129   : > { %v318_v60 = vadd.f32 %v317_v58, %v316_v57 }
 0x12b   : > { %v319_v61 = vadd.f32 %v318_v60, %v309_v59 }
 0x12d   : > { %321 = vst.msk [vmem:[#allocation4] sm:$0x1] %vm209_vm4, %v319_v61 }
 0x134   : > { %v324_v62 = vld [vmem:[#allocation4] sm:$0x1] }
 0x135   : > { %v325_v63 = vmul.f32 0.0625, %v324_v62 }
 0x137   : > { %336 = vperm.xlu2 %463, %v325_v63  }
 0x191   : > { %v337_v3 = vpop.permute.xlu2 %336 }
 0x192   : > { %v339_v5 = vperm.slane %v337_v3, 0 }
 0x194   : > { %v340_v6 = vsel %vm333_vm5, %v339_v5, %v330_v4 }
 0x195   : > { %342 = vst.msk [vmem:[%s202_s23] sm:$0x1] %vm341_vm6, %v340_v6 }
 0x196 PF: > { %s12_s11 = sadd.s32 1, %s487_s11   ;;  %s565_s9 = smov %s483_s10 }
 0x197   : > { %p9_p5 = scmp.ge.s32.totalorder %s12_s11, 4   ;;  %s566_s10 = smov %s568_s12 }
 0x199   :  { %11 = sbr.rel (!%p9_p5) target bundleno = 2 (0x2), region = 81 }

</bundles_post_ra>
